<compile_context>
chip_gen: v7x
topology: tpu7x:2x2x1
jax: 0.10.0
libtpu: 0.0.40
codegen_flags: <defaults>
</compile_context>

<pallas_src>
import jax
import jax.numpy as jnp
from jax import lax
from jax.experimental import pallas as pl
from jax.experimental.pallas import tpu as pltpu

DROPOUT_P = 0.5


def _round_up(n, m):
    return ((n + m - 1) // m) * m


def _vmem_budget_bytes():
    """Conservative per-kernel VMEM budget (generation aware, safe fallback)."""
    try:
        cap = int(pltpu.get_tpu_info().vmem_capacity_bytes)
    except Exception:
        cap = 64 * 1024 * 1024          # assume the smallest (v7x-like) VMEM
    return cap // 4                      # <= 32 MiB v5e/v6e, 16 MiB v7x


def _choose_time_chunk(T, Bp, Hp, max_time_chunk=None):
    """Largest Tc whose double-buffered blocks fit the VMEM budget."""
    budget = _vmem_budget_bytes()
    fixed = 2 * (Hp * Hp + Hp + Bp * Hp) * 4     # Wh, h0, resident h (2-buffered)
    per_step = 2 * Bp * Hp * 4                   # proj chunk, double-buffered
    tc = min(T, max(1, (budget - fixed) // per_step), 512)
    if max_time_chunk is not None:
        tc = min(tc, max_time_chunk)
    return max(1, int(tc))


def _make_recurrence_kernel(T, Tc):
    """Kernel over grid=(cdiv(T, Tc),): runs Tc serial RNN steps per grid step."""
    mask_tail = (T % Tc) != 0            # emit masking only when actually needed

    def kernel(proj_ref, wh_ref, h0_ref, h_ref):
        # proj_ref: (Tc, Bp, Hp) chunk of x@Wi^T + bi   (streamed, double-buffered)
        # wh_ref  : (Hp, Hp)     (1 - p) * Wh^T         (resident, constant index_map)
        # h0_ref  : (1, Hp)      initial hidden row     (resident)
        # h_ref   : (Bp, Hp)     resident output block == recurrent hidden state
        chunk = pl.program_id(0)

        @pl.when(chunk == 0)
        def _():
            h_ref[...] = jnp.broadcast_to(h0_ref[...], h_ref.shape)

        # Hoist the loop-invariant recurrent weight: one VMEM load, and the MXU
        # weight push has the best chance of staying out of the serial chain.
        wh = wh_ref[...]

        if mask_tail:
            valid = jnp.minimum(Tc, T - chunk * Tc)

        def step(t, h):
            hidden_res = jnp.dot(h, wh, preferred_element_type=jnp.float32)
            h_new = jnp.tanh(proj_ref[t] + hidden_res)
            if mask_tail:
                h_new = jnp.where(t < valid, h_new, h)
            return h_new

        h_ref[...] = lax.fori_loop(0, Tc, step, h_ref[...], unroll=min(Tc, 8))

    return kernel


def prepare_rnn_encoder_params(init_hidden, wi, bi, wh, dropout_p=DROPOUT_P):
    """One-time prep (model init): transpose, lane-pad, fold (1-p) into Wh.

    init_hidden: (1, 1, H)   wi: (H, F)   bi: (H,)   wh: (H, H)
    """
    H, F = wi.shape
    Hp = _round_up(H, 128)
    f32 = jnp.float32
    wi_t = jnp.zeros((F, Hp), f32).at[:, :H].set(wi.T.astype(f32))
    bi_p = jnp.zeros((Hp,), f32).at[:H].set(bi.astype(f32))
    # Fold the eval-mode dropout scale into the recurrent weight (exact, linear).
    wh_ts = jnp.zeros((Hp, Hp), f32).at[:H, :H].set(
        (1.0 - dropout_p) * wh.T.astype(f32))
    h0_p = jnp.zeros((1, Hp), f32).at[:, :H].set(
        init_hidden.reshape(1, H).astype(f32))
    return dict(wi_t=wi_t, bi_p=bi_p, wh_ts=wh_ts, h0_p=h0_p, H=H, F=F, Hp=Hp)


def rnn_encoder_forward(x, params, max_time_chunk=None):
    """x: (T, B, F) float32.  Returns hidden of shape (1, B, H) float32."""
    T, B, F = x.shape
    assert F == params["F"]
    H, Hp = params["H"], params["Hp"]
    f32 = jnp.float32

    Bp = _round_up(B, 8)                         # sublane alignment
    Tc = _choose_time_chunk(T, Bp, Hp, max_time_chunk)
    n_chunks = pl.cdiv(T, Tc)
    Tp = n_chunks * Tc

    # Phase 1 (i2h projection) as a single XLA matmul outside the kernel:
    # no F->128 lane-pad of the x stream, trivially parallel over T*B, and the
    # padded H columns come out exactly zero (padded Wi columns / bi are zero).
    proj = (x.reshape(T * B, F).astype(f32) @ params["wi_t"]
            + params["bi_p"]).reshape(T, B, Hp)

    # Pad batch to a sublane multiple / time to a chunk multiple only if needed
    # (padded timesteps are masked in-kernel; padded batch rows are sliced off).
    if (Tp, Bp) != (T, B):
        proj = jnp.zeros((Tp, Bp, Hp), f32).at[:T, :B, :].set(proj)

    # VMEM actually used by the kernel's (double-buffered) blocks + headroom.
    # Tc was chosen against <= cap/4, so this stays within every generation's
    # physical VMEM (addresses v5e's 16 MiB default scope explicitly).
    block_bytes = 2 * (Tc * Bp * Hp + Hp * Hp + Hp + Bp * Hp) * 4
    vmem_limit = int(min(max(32 * 1024 * 1024, 2 * block_bytes),
                         64 * 1024 * 1024))

    # NOTE: the weight / h0 / output blocks have constant index_maps, so they
    # are resident across the serial chunk axis; their double-buffer footprint
    # is tiny here (single-buffering them via pl.Buffered(1) is a production
    # option on v7x with large Hp).
    kernel = _make_recurrence_kernel(T, Tc)
    h_pad = pl.pallas_call(
        kernel,
        out_shape=jax.ShapeDtypeStruct((Bp, Hp), f32),
        grid_spec=pltpu.PrefetchScalarGridSpec(
            num_scalar_prefetch=0,
            grid=(n_chunks,),
            in_specs=[
                pl.BlockSpec((Tc, Bp, Hp), lambda c: (c, 0, 0)),   # proj chunk
                pl.BlockSpec((Hp, Hp), lambda c: (0, 0)),          # (1-p)*Wh^T
                pl.BlockSpec((1, Hp), lambda c: (0, 0)),           # h0 row
            ],
            out_specs=pl.BlockSpec((Bp, Hp), lambda c: (0, 0)),    # resident h
        ),
        compiler_params=pltpu.CompilerParams(
            dimension_semantics=("arbitrary",),                    # serial time
            vmem_limit_bytes=vmem_limit),
    )(proj, params["wh_ts"], params["h0_p"])

    return h_pad[:B, :H].reshape(1, B, H)


def rnn_encoder_reference(x, init_hidden, wi, bi, wh, dropout_p=DROPOUT_P):
    """Pure-JAX reference mirroring the PyTorch eval-mode forward."""
    T, B, F = x.shape
    H = wi.shape[0]
    h = jnp.broadcast_to(init_hidden[0], (B, H)).astype(jnp.float32)
    for t in range(T):
        input_res = x[t].astype(jnp.float32) @ wi.T + bi
        hidden_res = ((1.0 - dropout_p) * h) @ wh.T
        h = jnp.tanh(input_res + hidden_res)
    return h.reshape(1, B, H)


if __name__ == "__main__":
    # Small shapes consistent with the module's forward:
    #   x: (seq, batch, n_features), n_layers = 1
    seq_len, batch, n_features, n_hidden = 8, 2, 4, 32

    key = jax.random.PRNGKey(0)
    kx, kih, kwi, kbi, kwh, kx2 = jax.random.split(key, 6)

    x = jax.random.normal(kx, (seq_len, batch, n_features), dtype=jnp.float32)
    # nn.Parameter(torch.randn(n_layers, 1, n_hidden // n_layers))
    init_hidden = jax.random.normal(kih, (1, 1, n_hidden), dtype=jnp.float32)
    # i2h: Linear(n_features, n_hidden)  -> weight (H, F), bias (H,)
    wi = 0.1 * jax.random.normal(kwi, (n_hidden, n_features), dtype=jnp.float32)
    bi = 0.1 * jax.random.normal(kbi, (n_hidden,), dtype=jnp.float32)
    # h2h: Linear(n_hidden, n_hidden, bias=False) -> weight (H, H)
    wh = 0.1 * jax.random.normal(kwh, (n_hidden, n_hidden), dtype=jnp.float32)

    # One-time parameter prep (padded / transposed / dropout-scaled weights).
    params = prepare_rnn_encoder_params(init_hidden, wi, bi, wh)

    out = jax.block_until_ready(rnn_encoder_forward(x, params))
    ref = rnn_encoder_reference(x, init_hidden, wi, bi, wh)
    assert out.shape == (1, batch, n_hidden)
    assert jnp.allclose(out, ref, atol=1e-5, rtol=1e-5)

    # Exercise the multi-chunk / ragged-T / padded-batch path:
    # T=13 with a forced Tc=5 -> 3 chunks, last chunk masked to 3 valid steps.
    T2, B2 = 13, 3
    x2 = jax.random.normal(kx2, (T2, B2, n_features), dtype=jnp.float32)
    out2 = jax.block_until_ready(
        rnn_encoder_forward(x2, params, max_time_chunk=5))
    ref2 = rnn_encoder_reference(x2, init_hidden, wi, bi, wh)
    assert out2.shape == (1, B2, n_hidden)
    assert jnp.allclose(out2, ref2, atol=1e-5, rtol=1e-5)

    # TODO(synk): training-mode Bernoulli dropout mask (module.training=True)
    # is not implemented; this kernel is the eval-mode forward only.
    print("KERNEL_OK")
</pallas_src>

<mosaic_0001>
module attributes {stable_mosaic.version = 11 : i64} {
  func.func @kernel(%arg0: i32, %arg1: memref<8x8x128xf32, #tpu.memory_space<vmem>>, %arg2: memref<128x128xf32, #tpu.memory_space<vmem>>, %arg3: memref<1x128xf32, #tpu.memory_space<vmem>>, %arg4: memref<8x128xf32, #tpu.memory_space<vmem>>) attributes {dimension_semantics = [#tpu.dimension_semantics<arbitrary>], iteration_bounds = array<i64: 1>, scalar_prefetch = 0 : i64, scratch_operands = 0 : i64, tpu.core_type = #tpu.core_type<tc>, window_params = [{transform_indices = @transform_0, window_bounds = array<i64: 8, 8, 128>}, {pipeline_mode = #tpu.pipeline_mode<synchronous>, transform_indices = @transform_1, window_bounds = array<i64: 128, 128>}, {pipeline_mode = #tpu.pipeline_mode<synchronous>, transform_indices = @transform_2, window_bounds = array<i64: 1, 128>}, {pipeline_mode = #tpu.pipeline_mode<synchronous>, transform_indices = @transform_3, window_bounds = array<i64: 8, 128>}]} {
    %c0_i32 = arith.constant 0 : i32
    %0 = arith.cmpi eq, %arg0, %c0_i32 : i32
    %1 = arith.extui %0 : i1 to i32
    %c0_i32_0 = arith.constant 0 : i32
    %2 = arith.cmpi ne, %1, %c0_i32_0 : i32
    scf.if %2 {
      %c0_30 = arith.constant 0 : index
      %c0_31 = arith.constant 0 : index
      %54 = vector.load %arg3[%c0_30, %c0_31] : memref<1x128xf32, #tpu.memory_space<vmem>>, vector<1x128xf32>
      %55 = vector.shape_cast %54 : vector<1x128xf32> to vector<1x128xf32>
      %56 = vector.broadcast %55 : vector<1x128xf32> to vector<8x128xf32>
      %c0_32 = arith.constant 0 : index
      %c0_33 = arith.constant 0 : index
      %57 = vector.load %arg4[%c0_32, %c0_33] : memref<8x128xf32, #tpu.memory_space<vmem>>, vector<8x128xf32>
      tpu.vector_store %arg4[%c0_32, %c0_33], %56 {strides = array<i32>} : memref<8x128xf32, #tpu.memory_space<vmem>>, vector<8x128xf32>,
    } else {
    }
    %c0 = arith.constant 0 : index
    %c0_1 = arith.constant 0 : index
    %3 = vector.load %arg2[%c0, %c0_1] : memref<128x128xf32, #tpu.memory_space<vmem>>, vector<128x128xf32>
    %c0_2 = arith.constant 0 : index
    %c0_3 = arith.constant 0 : index
    %4 = vector.load %arg4[%c0_2, %c0_3] : memref<8x128xf32, #tpu.memory_space<vmem>>, vector<8x128xf32>
    %c0_i32_4 = arith.constant 0 : i32
    %cst = arith.constant dense<0.000000e+00> : vector<8x128xf32>
    %5 = tpu.matmul %4, %3, %cst {dimension_numbers = #tpu.dot_dimension_numbers<[1], [0], [0], [1], [0, 0, 1, 1], [], []>} : vector<8x128xf32>, vector<128x128xf32>, vector<8x128xf32> -> vector<8x128xf32>
    %6 = arith.index_cast %c0_i32_4 : i32 to index
    %c0_5 = arith.constant 0 : index
    %c0_6 = arith.constant 0 : index
    %7 = vector.load %arg1[%6, %c0_5, %c0_6] : memref<8x8x128xf32, #tpu.memory_space<vmem>>, vector<1x8x128xf32>
    %8 = vector.shape_cast %7 : vector<1x8x128xf32> to vector<8x128xf32>
    %9 = arith.addf %8, %5 : vector<8x128xf32>
    %10 = math.tanh %9 : vector<8x128xf32>
    %c1_i32 = arith.constant 1 : i32
    %cst_7 = arith.constant dense<0.000000e+00> : vector<8x128xf32>
    %11 = tpu.matmul %10, %3, %cst_7 {dimension_numbers = #tpu.dot_dimension_numbers<[1], [0], [0], [1], [0, 0, 1, 1], [], []>} : vector<8x128xf32>, vector<128x128xf32>, vector<8x128xf32> -> vector<8x128xf32>
    %12 = arith.index_cast %c1_i32 : i32 to index
    %c0_8 = arith.constant 0 : index
    %c0_9 = arith.constant 0 : index
    %13 = vector.load %arg1[%12, %c0_8, %c0_9] : memref<8x8x128xf32, #tpu.memory_space<vmem>>, vector<1x8x128xf32>
    %14 = vector.shape_cast %13 : vector<1x8x128xf32> to vector<8x128xf32>
    %15 = arith.addf %14, %11 : vector<8x128xf32>
    %16 = math.tanh %15 : vector<8x128xf32>
    %c2_i32 = arith.constant 2 : i32
    %cst_10 = arith.constant dense<0.000000e+00> : vector<8x128xf32>
    %17 = tpu.matmul %16, %3, %cst_10 {dimension_numbers = #tpu.dot_dimension_numbers<[1], [0], [0], [1], [0, 0, 1, 1], [], []>} : vector<8x128xf32>, vector<128x128xf32>, vector<8x128xf32> -> vector<8x128xf32>
    %18 = arith.index_cast %c2_i32 : i32 to index
    %c0_11 = arith.constant 0 : index
    %c0_12 = arith.constant 0 : index
    %19 = vector.load %arg1[%18, %c0_11, %c0_12] : memref<8x8x128xf32, #tpu.memory_space<vmem>>, vector<1x8x128xf32>
    %20 = vector.shape_cast %19 : vector<1x8x128xf32> to vector<8x128xf32>
    %21 = arith.addf %20, %17 : vector<8x128xf32>
    %22 = math.tanh %21 : vector<8x128xf32>
    %c3_i32 = arith.constant 3 : i32
    %cst_13 = arith.constant dense<0.000000e+00> : vector<8x128xf32>
    %23 = tpu.matmul %22, %3, %cst_13 {dimension_numbers = #tpu.dot_dimension_numbers<[1], [0], [0], [1], [0, 0, 1, 1], [], []>} : vector<8x128xf32>, vector<128x128xf32>, vector<8x128xf32> -> vector<8x128xf32>
    %24 = arith.index_cast %c3_i32 : i32 to index
    %c0_14 = arith.constant 0 : index
    %c0_15 = arith.constant 0 : index
    %25 = vector.load %arg1[%24, %c0_14, %c0_15] : memref<8x8x128xf32, #tpu.memory_space<vmem>>, vector<1x8x128xf32>
    %26 = vector.shape_cast %25 : vector<1x8x128xf32> to vector<8x128xf32>
    %27 = arith.addf %26, %23 : vector<8x128xf32>
    %28 = math.tanh %27 : vector<8x128xf32>
    %c4_i32 = arith.constant 4 : i32
    %cst_16 = arith.constant dense<0.000000e+00> : vector<8x128xf32>
    %29 = tpu.matmul %28, %3, %cst_16 {dimension_numbers = #tpu.dot_dimension_numbers<[1], [0], [0], [1], [0, 0, 1, 1], [], []>} : vector<8x128xf32>, vector<128x128xf32>, vector<8x128xf32> -> vector<8x128xf32>
    %30 = arith.index_cast %c4_i32 : i32 to index
    %c0_17 = arith.constant 0 : index
    %c0_18 = arith.constant 0 : index
    %31 = vector.load %arg1[%30, %c0_17, %c0_18] : memref<8x8x128xf32, #tpu.memory_space<vmem>>, vector<1x8x128xf32>
    %32 = vector.shape_cast %31 : vector<1x8x128xf32> to vector<8x128xf32>
    %33 = arith.addf %32, %29 : vector<8x128xf32>
    %34 = math.tanh %33 : vector<8x128xf32>
    %c5_i32 = arith.constant 5 : i32
    %cst_19 = arith.constant dense<0.000000e+00> : vector<8x128xf32>
    %35 = tpu.matmul %34, %3, %cst_19 {dimension_numbers = #tpu.dot_dimension_numbers<[1], [0], [0], [1], [0, 0, 1, 1], [], []>} : vector<8x128xf32>, vector<128x128xf32>, vector<8x128xf32> -> vector<8x128xf32>
    %36 = arith.index_cast %c5_i32 : i32 to index
    %c0_20 = arith.constant 0 : index
    %c0_21 = arith.constant 0 : index
    %37 = vector.load %arg1[%36, %c0_20, %c0_21] : memref<8x8x128xf32, #tpu.memory_space<vmem>>, vector<1x8x128xf32>
    %38 = vector.shape_cast %37 : vector<1x8x128xf32> to vector<8x128xf32>
    %39 = arith.addf %38, %35 : vector<8x128xf32>
    %40 = math.tanh %39 : vector<8x128xf32>
    %c6_i32 = arith.constant 6 : i32
    %cst_22 = arith.constant dense<0.000000e+00> : vector<8x128xf32>
    %41 = tpu.matmul %40, %3, %cst_22 {dimension_numbers = #tpu.dot_dimension_numbers<[1], [0], [0], [1], [0, 0, 1, 1], [], []>} : vector<8x128xf32>, vector<128x128xf32>, vector<8x128xf32> -> vector<8x128xf32>
    %42 = arith.index_cast %c6_i32 : i32 to index
    %c0_23 = arith.constant 0 : index
    %c0_24 = arith.constant 0 : index
    %43 = vector.load %arg1[%42, %c0_23, %c0_24] : memref<8x8x128xf32, #tpu.memory_space<vmem>>, vector<1x8x128xf32>
    %44 = vector.shape_cast %43 : vector<1x8x128xf32> to vector<8x128xf32>
    %45 = arith.addf %44, %41 : vector<8x128xf32>
    %46 = math.tanh %45 : vector<8x128xf32>
    %c7_i32 = arith.constant 7 : i32
    %cst_25 = arith.constant dense<0.000000e+00> : vector<8x128xf32>
    %47 = tpu.matmul %46, %3, %cst_25 {dimension_numbers = #tpu.dot_dimension_numbers<[1], [0], [0], [1], [0, 0, 1, 1], [], []>} : vector<8x128xf32>, vector<128x128xf32>, vector<8x128xf32> -> vector<8x128xf32>
    %48 = arith.index_cast %c7_i32 : i32 to index
    %c0_26 = arith.constant 0 : index
    %c0_27 = arith.constant 0 : index
    %49 = vector.load %arg1[%48, %c0_26, %c0_27] : memref<8x8x128xf32, #tpu.memory_space<vmem>>, vector<1x8x128xf32>
    %50 = vector.shape_cast %49 : vector<1x8x128xf32> to vector<8x128xf32>
    %51 = arith.addf %50, %47 : vector<8x128xf32>
    %52 = math.tanh %51 : vector<8x128xf32>
    %c8_i32 = arith.constant 8 : i32
    %c0_28 = arith.constant 0 : index
    %c0_29 = arith.constant 0 : index
    %53 = vector.load %arg4[%c0_28, %c0_29] : memref<8x128xf32, #tpu.memory_space<vmem>>, vector<8x128xf32>
    tpu.vector_store %arg4[%c0_28, %c0_29], %52 {strides = array<i32>} : memref<8x128xf32, #tpu.memory_space<vmem>>, vector<8x128xf32>,
    return
  }
  func.func @transform_0(%arg0: i32) -> (i32, i32, i32) {
    %c0_i32 = arith.constant 0 : i32
    %c0_i32_0 = arith.constant 0 : i32
    %c0_i32_1 = arith.constant 0 : i32
    return %arg0, %c0_i32, %c0_i32_0 : i32, i32, i32
  }
  func.func @transform_1(%arg0: i32) -> (i32, i32) {
    %c0_i32 = arith.constant 0 : i32
    %c0_i32_0 = arith.constant 0 : i32
    %c0_i32_1 = arith.constant 0 : i32
    return %c0_i32, %c0_i32_0 : i32, i32
  }
  func.func @transform_2(%arg0: i32) -> (i32, i32) {
    %c0_i32 = arith.constant 0 : i32
    %c0_i32_0 = arith.constant 0 : i32
    %c0_i32_1 = arith.constant 0 : i32
    return %c0_i32, %c0_i32_0 : i32, i32
  }
  func.func @transform_3(%arg0: i32) -> (i32, i32) {
    %c0_i32 = arith.constant 0 : i32
    %c0_i32_0 = arith.constant 0 : i32
    %c0_i32_1 = arith.constant 0 : i32
    return %c0_i32, %c0_i32_0 : i32, i32
  }
}

</mosaic_0001>

<bundles_post_ra>
// kernel: tpu_custom_call.1
= control target key start
LH: loop header
LB: loop body
LE: loop exit
PB: predicated region body
PF: predicated region fallthrough
CT: control target
= control target key end

     0   :  { %8 = vsyncpa [#allocation3], 0  ;;  %s1612_s0 = inlined_call_operand.hbm [shape: f32[8,8,128], index: 0, kind: input, shape index: {}]   ;;  %s1613_s1 = inlined_call_operand.hbm [shape: f32[128,128], index: 1, kind: input, shape index: {}]   ;;  %s1614_s2 = inlined_call_operand.vmem [shape: f32[1,128], index: 2, kind: input, shape index: {}]   ;;  %s1615_s3 = inlined_call_operand.hbm [shape: f32[8,128], index: 3, kind: output, shape index: {}]  }
   0x1   :  { %9 = vsyncpa [#allocation6], 0 }
   0x2   :  { %10 = vsyncpa [#allocation4], 0  ;;  %s1385_s12 = smov [#allocation2]   ;;  %s1313_s16 = scalar_lea.hbm %s1612_s0, 1024 }
   0x3   :  { %s16_s13 = sshll.u32 %s1385_s12, 4  ;;  %p1314_p0 = scmp.ne.s32.totalorder %s1612_s0, %s1313_s16  ;;  %s17_s13 = int_to_ptr.vmem [resolvable:$true] %s16_s13 }
   0x4   :  { %p1317_p1 = scmp.lt.u32.totalorder %s1313_s16, %s1612_s0 }
   0x6   :  { %p1319_p2 = pnand %p1317_p1, %p1314_p0 }
   0x8   :  { %1322 = shalt.err (!%p1319_p2)
}
   0x9   :  { %s1323_s21 = scalar_lea.vmem %s17_s13, 1024  ;;  %p1328_p4 = scmp.lt.s32.totalorder %s17_s13, %s17_s13 }
   0xa   :  { %p1324_p3 = scmp.ne.s32.totalorder %s17_s13, %s1323_s21  ;;  %p1329_p5 = scmp.lt.s32.totalorder %s1323_s21, %s1323_s21 }
   0xc   :  { %p1330_p6 = por %p1329_p5, %p1328_p4 }
   0xe   :  { %p1331_p7 = pnand %p1330_p6, %p1324_p3 }
  0x10   :  { %1334 = shalt.err (!%p1331_p7)
}
  0x11   :  { %s1386_s22 = smov 128   ;;  %s1387_s23 = smov 8  }
  0x12   :  { %22 = dma.hbm_to_vmem [thread:$0]  %s1612_s0, 1024, %s17_s13, [#allocation3], %s1386_s22, %s1386_s22, %s1387_s23  }
  0x13   :  { %s1388_s26 = smov [#allocation5]   ;;  %s1335_s30 = scalar_lea.hbm %s1613_s1, 2048 }
  0x14   :  { %s28_s27 = sshll.u32 %s1388_s26, 4  ;;  %p1336_p8 = scmp.ne.s32.totalorder %s1613_s1, %s1335_s30  ;;  %s29_s27 = int_to_ptr.vmem [resolvable:$true] %s28_s27 }
  0x15   :  { %p1339_p9 = scmp.lt.u32.totalorder %s1335_s30, %s1613_s1 }
  0x17   :  { %p1341_p10 = pnand %p1339_p9, %p1336_p8 }
  0x19   :  { %1344 = shalt.err (!%p1341_p10)
}
  0x1a   :  { %s1345_s8 = scalar_lea.vmem %s29_s27, 2048  ;;  %p1350_p12 = scmp.lt.s32.totalorder %s29_s27, %s29_s27 }
  0x1b   :  { %p1346_p11 = scmp.ne.s32.totalorder %s29_s27, %s1345_s8  ;;  %p1351_p13 = scmp.lt.s32.totalorder %s1345_s8, %s1345_s8 }
  0x1d   :  { %p1352_p0 = por %p1351_p13, %p1350_p12 }
  0x1f   :  { %p1353_p1 = pnand %p1352_p0, %p1346_p11 }
  0x21   :  { %1356 = shalt.err (!%p1353_p1)
}
  0x22   :  { %34 = dma.hbm_to_vmem [thread:$0]  %s1613_s1, 2048, %s29_s27, [#allocation6], %s1386_s22, %s1386_s22, %s1387_s23  }
  0x23   :  { %1379 = dma.done.wait [#allocation3], 1024  }
  0x24   :  { %1380 = vsyncadd [#allocation3], 4294966272 }
  0x25   :  { %1381 = dma.done.wait [#allocation6], 2048  }
  0x26   :  { %1382 = vsyncadd [#allocation6], 4294965248  ;;  %v1389_v0 = vmov 0.0|0.0   ;;  %vm1390_vm0 = vmmov 0   ;;  %v1391_v1 = vmov 0.0   ;;  %v55_v2 = vld [vmem:[#allocation5] sm:$0xff] }
  0x27   :  { %1097 = vmatprep.subr.bf16.mxu0 %v1389_v0  ;;  %849 = vmatprep.mubr.msk.f32.mxu0 %vm1390_vm0, %v1391_v1  ;;  %v56_v3 = vld [vmem:[#allocation5 + $0x8] sm:$0xff]  ;;  %v57_v4 = vld [vmem:[#allocation5 + $0x10] sm:$0xff]  ;;  %v58_v6 = vld [vmem:[#allocation5 + $0x18] sm:$0xff] }
  0x28   :  { %1121 = vmatprep.subr.bf16.mxu1 %v1389_v0  ;;  %884 = vmatprep.mubr.msk.f32.mxu1 %vm1390_vm0, %v1391_v1  ;;  %v1443_v5 = vpack.c.bf16 %v56_v3, %v55_v2  ;;  %v1446_v7 = vpack.c.bf16 %v58_v6, %v57_v4  ;;  %v59_v8 = vld [vmem:[#allocation5 + $0x20] sm:$0xff]  ;;  %v60_v9 = vld [vmem:[#allocation5 + $0x28] sm:$0xff]  ;;  %v61_v11 = vld [vmem:[#allocation5 + $0x30] sm:$0xff] }
  0x29   :  { %v1452_v10 = vpack.c.bf16 %v60_v9, %v59_v8  ;;  %v62_v12 = vld [vmem:[#allocation5 + $0x38] sm:$0xff]  ;;  %v63_v14 = vld [vmem:[#allocation5 + $0x40] sm:$0xff]  ;;  %v64_v15 = vld [vmem:[#allocation5 + $0x48] sm:$0xff] }
  0x2a   :  { %1099 = vmatpush3.bf16.msra.mxu0 %v1443_v5  ;;  %1123 = vmatpush3.bf16.msra.mxu1 %v1443_v5  ;;  %v1458_v13 = vpack.c.bf16 %v62_v12, %v61_v11  ;;  %v1464_v16 = vpack.c.bf16 %v64_v15, %v63_v14  ;;  %v65_v17 = vld [vmem:[#allocation5 + $0x50] sm:$0xff]  ;;  %v66_v18 = vld [vmem:[#allocation5 + $0x58] sm:$0xff]  ;;  %v67_v20 = vld [vmem:[#allocation5 + $0x60] sm:$0xff] }
  0x2b   :  { %1100 = vmatprep.subr.bf16.mxu0 %v1389_v0  ;;  %1124 = vmatprep.subr.bf16.mxu1 %v1389_v0  ;;  %v1470_v19 = vpack.c.bf16 %v66_v18, %v65_v17  ;;  %v68_v21 = vld [vmem:[#allocation5 + $0x68] sm:$0xff]  ;;  %v69_v23 = vld [vmem:[#allocation5 + $0x70] sm:$0xff]  ;;  %v70_v24 = vld [vmem:[#allocation5 + $0x78] sm:$0xff] }
  0x2c   :  { %v1476_v22 = vpack.c.bf16 %v68_v21, %v67_v20  ;;  %v1482_v25 = vpack.c.bf16 %v70_v24, %v69_v23  ;;  %v680_v26 = vld [vmem:[%s1614_s2] ss:$0 sm:$0xff]  ;;  %v216_v32 = vld [vmem:[#allocation2 + $0x8] sm:$0xff]  ;;  %v290_v37 = vld [vmem:[#allocation2 + $0x10] sm:$0xff]  ;;  %s1392_s2 = smov [#allocation7]  }
  0x2d   :  { %v142_v27 = vld [vmem:[#allocation2] sm:$0xff]  ;;  %v364_v42 = vld [vmem:[#allocation2 + $0x18] sm:$0xff]  ;;  %v512_v52 = vld [vmem:[#allocation2 + $0x28] sm:$0xff]  ;;  %s670_s11 = sshll.u32 %s1392_s2, 4  ;;  %s671_s11 = int_to_ptr.vmem [resolvable:$true] %s670_s11 }
  0x2e   :  { %1102 = vmatpush3.bf16.msra.mxu0 %v1446_v7  ;;  %1126 = vmatpush3.bf16.msra.mxu1 %v1446_v7  ;;  %v438_v47 = vld [vmem:[#allocation2 + $0x20] sm:$0xff]  ;;  %v586_v57 = vld [vmem:[#allocation2 + $0x30] sm:$0xff]  ;;  %v660_v62 = vld [vmem:[#allocation2 + $0x38] sm:$0xff]  ;;  %s1357_s12 = scalar_lea.vmem %s671_s11, 128  ;;  %p1362_p3 = scmp.lt.s32.totalorder %s671_s11, %s671_s11 }
  0x2f   :  { %1103 = vmatprep.subr.bf16.mxu0 %v1389_v0  ;;  %1127 = vmatprep.subr.bf16.mxu1 %v1389_v0  ;;  %p1358_p2 = scmp.ne.s32.totalorder %s671_s11, %s1357_s12  ;;  %p1363_p4 = scmp.lt.s32.totalorder %s1357_s12, %s1357_s12 }
  0x31   :  { %p1364_p5 = por %p1363_p4, %p1362_p3 }
  0x32   :  { %1105 = vmatpush3.bf16.msra.mxu0 %v1452_v10  ;;  %1129 = vmatpush3.bf16.msra.mxu1 %v1452_v10 }
  0x33   :  { %1106 = vmatprep.subr.bf16.mxu0 %v1389_v0  ;;  %1130 = vmatprep.subr.bf16.mxu1 %v1389_v0  ;;  %p1365_p6 = pnand %p1364_p5, %p1358_p2 }
  0x36   :  { %1108 = vmatpush3.bf16.msra.mxu0 %v1458_v13  ;;  %1132 = vmatpush3.bf16.msra.mxu1 %v1458_v13 }
  0x37   :  { %1109 = vmatprep.subr.bf16.mxu0 %v1389_v0  ;;  %1133 = vmatprep.subr.bf16.mxu1 %v1389_v0 }
  0x3a   :  { %1111 = vmatpush3.bf16.msra.mxu0 %v1464_v16  ;;  %1135 = vmatpush3.bf16.msra.mxu1 %v1464_v16 }
  0x3b   :  { %1112 = vmatprep.subr.bf16.mxu0 %v1389_v0  ;;  %1136 = vmatprep.subr.bf16.mxu1 %v1389_v0 }
  0x3e   :  { %1114 = vmatpush3.bf16.msra.mxu0 %v1470_v19  ;;  %1138 = vmatpush3.bf16.msra.mxu1 %v1470_v19 }
  0x3f   :  { %1115 = vmatprep.subr.bf16.mxu0 %v1389_v0  ;;  %1139 = vmatprep.subr.bf16.mxu1 %v1389_v0 }
  0x42   :  { %1117 = vmatpush3.bf16.msra.mxu0 %v1476_v22  ;;  %1141 = vmatpush3.bf16.msra.mxu1 %v1476_v22 }
  0x43   :  { %1118 = vmatprep.subr.bf16.mxu0 %v1389_v0  ;;  %1142 = vmatprep.subr.bf16.mxu1 %v1389_v0 }
  0x46   :  { %1120 = vmatpush3.bf16.msra.mxu0 %v1482_v25  ;;  %1144 = vmatpush3.bf16.msra.mxu1 %v1482_v25 }
  0x47   :  { %1145 = vmatprep.subr.bf16.mxu0 %v1389_v0  ;;  %1169 = vmatprep.subr.bf16.mxu1 %v1389_v0 }
  0x49   :  { %850 = vmatmul.mubr.f32.vlgmr.msra.gmra.mrb[0].mxu0 %v680_v26 }
  0x4a   :  { %1147 = vmatpush3.bf16.msra.mxu0 %v1443_v5  ;;  %919 = vmatprep.mubr.msk.f32.mxu0 %vm1390_vm0, %v1391_v1 }
  0x4b   :  { %1148 = vmatprep.subr.bf16.mxu0 %v1389_v0 }
  0x4e   :  { %1150 = vmatpush3.bf16.msra.mxu0 %v1446_v7 }
  0x4f   :  { %1151 = vmatprep.subr.bf16.mxu0 %v1389_v0 }
  0x52   :  { %1153 = vmatpush3.bf16.msra.mxu0 %v1452_v10 }
  0x53   :  { %1154 = vmatprep.subr.bf16.mxu0 %v1389_v0 }
  0x56   :  { %1156 = vmatpush3.bf16.msra.mxu0 %v1458_v13 }
  0x57   :  { %1157 = vmatprep.subr.bf16.mxu0 %v1389_v0 }
  0x5a   :  { %1159 = vmatpush3.bf16.msra.mxu0 %v1464_v16 }
  0x5b   :  { %1160 = vmatprep.subr.bf16.mxu0 %v1389_v0 }
  0x5e   :  { %1162 = vmatpush3.bf16.msra.mxu0 %v1470_v19 }
  0x5f   :  { %1163 = vmatprep.subr.bf16.mxu0 %v1389_v0 }
  0x62   :  { %1165 = vmatpush3.bf16.msra.mxu0 %v1476_v22 }
  0x63   :  { %1166 = vmatprep.subr.bf16.mxu0 %v1389_v0 }
  0x66   :  { %1168 = vmatpush3.bf16.msra.mxu0 %v1482_v25 }
  0x67   :  { %1193 = vmatprep.subr.bf16.mxu0 %v1389_v0 }
 0x11c   :  { %v138_v28 = vpop.f32.mrb[0].mxu0 }
 0x11d   :  { %v143_v29 = vadd.f32 %v142_v27, %v138_v28  ;;  %v851_v30 = vpop.f32.mrb[1].mxu0 }
 0x11f   :  { %1297 = vtanh.f32 %v143_v29 }
 0x129   :  { %v1298_v31 = vpop.eup %1297 }
 0x12a   :  { %885 = vmatmul.mubr.f32.vlgmr.msra.gmra.mrb[0].mxu1 %v1298_v31 }
 0x12b   :  { %1171 = vmatpush3.bf16.msra.mxu1 %v1443_v5  ;;  %954 = vmatprep.mubr.msk.f32.mxu1 %vm1390_vm0, %v1391_v1 }
 0x12c   :  { %1172 = vmatprep.subr.bf16.mxu1 %v1389_v0 }
 0x12f   :  { %1174 = vmatpush3.bf16.msra.mxu1 %v1446_v7 }
 0x130   :  { %1175 = vmatprep.subr.bf16.mxu1 %v1389_v0 }
 0x133   :  { %1177 = vmatpush3.bf16.msra.mxu1 %v1452_v10 }
 0x134   :  { %1178 = vmatprep.subr.bf16.mxu1 %v1389_v0 }
 0x137   :  { %1180 = vmatpush3.bf16.msra.mxu1 %v1458_v13 }
 0x138   :  { %1181 = vmatprep.subr.bf16.mxu1 %v1389_v0 }
 0x13b   :  { %1183 = vmatpush3.bf16.msra.mxu1 %v1464_v16 }
 0x13c   :  { %1184 = vmatprep.subr.bf16.mxu1 %v1389_v0 }
 0x13f   :  { %1186 = vmatpush3.bf16.msra.mxu1 %v1470_v19 }
 0x140   :  { %1187 = vmatprep.subr.bf16.mxu1 %v1389_v0 }
 0x143   :  { %1189 = vmatpush3.bf16.msra.mxu1 %v1476_v22 }
 0x144   :  { %1190 = vmatprep.subr.bf16.mxu1 %v1389_v0 }
 0x147   :  { %1192 = vmatpush3.bf16.msra.mxu1 %v1482_v25 }
 0x148   :  { %1217 = vmatprep.subr.bf16.mxu1 %v1389_v0 }
 0x1fd   :  { %v211_v33 = vpop.f32.mrb[0].mxu1 }
 0x1fe   :  { %v217_v34 = vadd.f32 %v216_v32, %v211_v33  ;;  %v886_v35 = vpop.f32.mrb[1].mxu1 }
 0x200   :  { %1299 = vtanh.f32 %v217_v34 }
 0x20a   :  { %v1300_v36 = vpop.eup %1299 }
 0x20b   :  { %920 = vmatmul.mubr.f32.vlgmr.msra.gmra.mrb[2].mxu0 %v1300_v36 }
 0x20c   :  { %1195 = vmatpush3.bf16.msra.mxu0 %v1443_v5  ;;  %989 = vmatprep.mubr.msk.f32.mxu0 %vm1390_vm0, %v1391_v1 }
 0x20d   :  { %1196 = vmatprep.subr.bf16.mxu0 %v1389_v0 }
 0x210   :  { %1198 = vmatpush3.bf16.msra.mxu0 %v1446_v7 }
 0x211   :  { %1199 = vmatprep.subr.bf16.mxu0 %v1389_v0 }
 0x214   :  { %1201 = vmatpush3.bf16.msra.mxu0 %v1452_v10 }
 0x215   :  { %1202 = vmatprep.subr.bf16.mxu0 %v1389_v0 }
 0x218   :  { %1204 = vmatpush3.bf16.msra.mxu0 %v1458_v13 }
 0x219   :  { %1205 = vmatprep.subr.bf16.mxu0 %v1389_v0 }
 0x21c   :  { %1207 = vmatpush3.bf16.msra.mxu0 %v1464_v16 }
 0x21d   :  { %1208 = vmatprep.subr.bf16.mxu0 %v1389_v0 }
 0x220   :  { %1210 = vmatpush3.bf16.msra.mxu0 %v1470_v19 }
 0x221   :  { %1211 = vmatprep.subr.bf16.mxu0 %v1389_v0 }
 0x224   :  { %1213 = vmatpush3.bf16.msra.mxu0 %v1476_v22 }
 0x225   :  { %1214 = vmatprep.subr.bf16.mxu0 %v1389_v0 }
 0x228   :  { %1216 = vmatpush3.bf16.msra.mxu0 %v1482_v25 }
 0x229   :  { %1241 = vmatprep.subr.bf16.mxu0 %v1389_v0 }
 0x2de   :  { %v285_v38 = vpop.f32.mrb[2].mxu0 }
 0x2df   :  { %v291_v39 = vadd.f32 %v290_v37, %v285_v38  ;;  %v921_v40 = vpop.f32.mrb[3].mxu0 }
 0x2e1   :  { %1301 = vtanh.f32 %v291_v39 }
 0x2eb   :  { %v1302_v41 = vpop.eup %1301 }
 0x2ec   :  { %955 = vmatmul.mubr.f32.vlgmr.msra.gmra.mrb[2].mxu1 %v1302_v41 }
 0x2ed   :  { %1219 = vmatpush3.bf16.msra.mxu1 %v1443_v5  ;;  %1024 = vmatprep.mubr.msk.f32.mxu1 %vm1390_vm0, %v1391_v1 }
 0x2ee   :  { %1220 = vmatprep.subr.bf16.mxu1 %v1389_v0 }
 0x2f1   :  { %1222 = vmatpush3.bf16.msra.mxu1 %v1446_v7 }
 0x2f2   :  { %1223 = vmatprep.subr.bf16.mxu1 %v1389_v0 }
 0x2f5   :  { %1225 = vmatpush3.bf16.msra.mxu1 %v1452_v10 }
 0x2f6   :  { %1226 = vmatprep.subr.bf16.mxu1 %v1389_v0 }
 0x2f9   :  { %1228 = vmatpush3.bf16.msra.mxu1 %v1458_v13 }
 0x2fa   :  { %1229 = vmatprep.subr.bf16.mxu1 %v1389_v0 }
 0x2fd   :  { %1231 = vmatpush3.bf16.msra.mxu1 %v1464_v16 }
 0x2fe   :  { %1232 = vmatprep.subr.bf16.mxu1 %v1389_v0 }
 0x301   :  { %1234 = vmatpush3.bf16.msra.mxu1 %v1470_v19 }
 0x302   :  { %1235 = vmatprep.subr.bf16.mxu1 %v1389_v0 }
 0x305   :  { %1237 = vmatpush3.bf16.msra.mxu1 %v1476_v22 }
 0x306   :  { %1238 = vmatprep.subr.bf16.mxu1 %v1389_v0 }
 0x309   :  { %1240 = vmatpush3.bf16.msra.mxu1 %v1482_v25 }
 0x30a   :  { %1265 = vmatprep.subr.bf16.mxu1 %v1389_v0 }
 0x3bf   :  { %v359_v43 = vpop.f32.mrb[2].mxu1 }
 0x3c0   :  { %v365_v44 = vadd.f32 %v364_v42, %v359_v43  ;;  %v956_v45 = vpop.f32.mrb[3].mxu1 }
 0x3c2   :  { %1303 = vtanh.f32 %v365_v44 }
 0x3cc   :  { %v1304_v46 = vpop.eup %1303 }
 0x3cd   :  { %990 = vmatmul.mubr.f32.vlgmr.msra.gmra.mrb[4].mxu0 %v1304_v46 }
 0x3ce   :  { %1243 = vmatpush3.bf16.msra.mxu0 %v1443_v5  ;;  %1059 = vmatprep.mubr.msk.f32.mxu0 %vm1390_vm0, %v1391_v1 }
 0x3cf   :  { %1244 = vmatprep.subr.bf16.mxu0 %v1389_v0 }
 0x3d2   :  { %1246 = vmatpush3.bf16.msra.mxu0 %v1446_v7 }
 0x3d3   :  { %1247 = vmatprep.subr.bf16.mxu0 %v1389_v0 }
 0x3d6   :  { %1249 = vmatpush3.bf16.msra.mxu0 %v1452_v10 }
 0x3d7   :  { %1250 = vmatprep.subr.bf16.mxu0 %v1389_v0 }
 0x3da   :  { %1252 = vmatpush3.bf16.msra.mxu0 %v1458_v13 }
 0x3db   :  { %1253 = vmatprep.subr.bf16.mxu0 %v1389_v0 }
 0x3de   :  { %1255 = vmatpush3.bf16.msra.mxu0 %v1464_v16 }
 0x3df   :  { %1256 = vmatprep.subr.bf16.mxu0 %v1389_v0 }
 0x3e2   :  { %1258 = vmatpush3.bf16.msra.mxu0 %v1470_v19 }
 0x3e3   :  { %1259 = vmatprep.subr.bf16.mxu0 %v1389_v0 }
 0x3e6   :  { %1261 = vmatpush3.bf16.msra.mxu0 %v1476_v22 }
 0x3e7   :  { %1262 = vmatprep.subr.bf16.mxu0 %v1389_v0 }
 0x3ea   :  { %1264 = vmatpush3.bf16.msra.mxu0 %v1482_v25 }
 0x4a0   :  { %v433_v48 = vpop.f32.mrb[4].mxu0 }
 0x4a1   :  { %v439_v49 = vadd.f32 %v438_v47, %v433_v48  ;;  %v991_v50 = vpop.f32.mrb[5].mxu0 }
 0x4a3   :  { %1305 = vtanh.f32 %v439_v49 }
 0x4ad   :  { %v1306_v51 = vpop.eup %1305 }
 0x4ae   :  { %1025 = vmatmul.mubr.f32.vlgmr.msra.gmra.mrb[4].mxu1 %v1306_v51 }
 0x4af   :  { %1267 = vmatpush3.bf16.msra.mxu1 %v1443_v5  ;;  %1094 = vmatprep.mubr.msk.f32.mxu1 %vm1390_vm0, %v1391_v1 }
 0x4b0   :  { %1268 = vmatprep.subr.bf16.mxu1 %v1389_v0 }
 0x4b3   :  { %1270 = vmatpush3.bf16.msra.mxu1 %v1446_v7 }
 0x4b4   :  { %1271 = vmatprep.subr.bf16.mxu1 %v1389_v0 }
 0x4b7   :  { %1273 = vmatpush3.bf16.msra.mxu1 %v1452_v10 }
 0x4b8   :  { %1274 = vmatprep.subr.bf16.mxu1 %v1389_v0 }
 0x4bb   :  { %1276 = vmatpush3.bf16.msra.mxu1 %v1458_v13 }
 0x4bc   :  { %1277 = vmatprep.subr.bf16.mxu1 %v1389_v0 }
 0x4bf   :  { %1279 = vmatpush3.bf16.msra.mxu1 %v1464_v16 }
 0x4c0   :  { %1280 = vmatprep.subr.bf16.mxu1 %v1389_v0 }
 0x4c3   :  { %1282 = vmatpush3.bf16.msra.mxu1 %v1470_v19 }
 0x4c4   :  { %1283 = vmatprep.subr.bf16.mxu1 %v1389_v0 }
 0x4c7   :  { %1285 = vmatpush3.bf16.msra.mxu1 %v1476_v22 }
 0x4c8   :  { %1286 = vmatprep.subr.bf16.mxu1 %v1389_v0 }
 0x4cb   :  { %1288 = vmatpush3.bf16.msra.mxu1 %v1482_v25 }
 0x581   :  { %v507_v53 = vpop.f32.mrb[4].mxu1 }
 0x582   :  { %v513_v54 = vadd.f32 %v512_v52, %v507_v53  ;;  %v1026_v55 = vpop.f32.mrb[5].mxu1 }
 0x584   :  { %1307 = vtanh.f32 %v513_v54 }
 0x58e   :  { %v1308_v56 = vpop.eup %1307 }
 0x58f   :  { %1060 = vmatmul.mubr.f32.vlgmr.msra.gmra.mrb[6].mxu0 %v1308_v56 }
 0x662   :  { %v581_v58 = vpop.f32.mrb[6].mxu0 }
 0x663   :  { %v587_v59 = vadd.f32 %v586_v57, %v581_v58  ;;  %v1061_v60 = vpop.f32.mrb[7].mxu0 }
 0x665   :  { %1309 = vtanh.f32 %v587_v59 }
 0x66f   :  { %v1310_v61 = vpop.eup %1309 }
 0x670   :  { %1095 = vmatmul.mubr.f32.vlgmr.msra.gmra.mrb[6].mxu1 %v1310_v61 }
 0x743   :  { %v655_v63 = vpop.f32.mrb[6].mxu1 }
 0x744   :  { %v661_v1 = vadd.f32 %v660_v62, %v655_v63  ;;  %v1096_v0 = vpop.f32.mrb[7].mxu1 }
 0x746   :  { %1311 = vtanh.f32 %v661_v1 }
 0x750   :  { %v1312_v2 = vpop.eup %1311 }
 0x751   :  { %663 = vst [vmem:[#allocation7] sm:$0xff] %v1312_v2 }
 0x752   :  { %1368 = shalt.err (!%p1365_p6)
}
 0x753   :  { %s1369_s15 = scalar_lea.hbm %s1615_s3, 128 }
 0x754   :  { %p1370_p7 = scmp.ne.s32.totalorder %s1615_s3, %s1369_s15  ;;  %p1373_p8 = scmp.lt.u32.totalorder %s1369_s15, %s1615_s3 }
 0x756   :  { %p1375_p9 = pnand %p1373_p8, %p1370_p7 }
 0x758   :  { %1378 = shalt.err (!%p1375_p9)
}
 0x759   :  { %673 = dma.vmem_to_hbm [thread:$0]  %s671_s11, 128, %s1615_s3, [#allocation4]  }
 0x75a   :  { %1383 = dma.done.wait [#allocation4], 128  }
 0x75b   :  { %1384 = vsyncadd [#allocation4], 4294967168 }
 0x75c   :  { %677 = vsyncpa [#allocation3], 1 }
 0x75d   :  { %678 = vsyncpa [#allocation6], 1 }
 0x75e   :  { %679 = vsyncpa [#allocation4], 1 }

</bundles_post_ra>
